<compile_context>
chip_gen: v6e
topology: v6e:2x2x1
jax: 0.10.0
libtpu: 0.0.40
codegen_flags: <defaults>
</compile_context>

<pallas_src>
import functools

import jax
import jax.numpy as jnp
from jax.experimental import pallas as pl
from jax.experimental.pallas import tpu as pltpu

_LANE_CANDIDATES = (2048, 1024, 512, 256, 128)   # widest lane-dense col count first
_PAD_COLS = 1024                                  # lane width for the ragged/pad path
_SMALL_BYPASS_BYTES = 1 << 20                     # < 1 MiB: fused XLA op beats a launch


def _sublane_multiple(dtype):
    # Packed rows per 32-bit sublane word: f32 -> 8, bf16/f16 -> 16, int8/fp8 -> 32.
    return 8 * max(1, 4 // jnp.dtype(dtype).itemsize)


def _vmem_capacity_bytes():
    # Physical VMEM per core (v5e/v6e: 128 MiB, v7x: 64 MiB). Conservative default.
    try:
        info = pltpu.get_tpu_info()
        return int(getattr(info, "vmem_capacity_bytes", 64 << 20))
    except Exception:
        return 64 << 20


def _neg_scale(x, coeff):
    """-coeff * x. Narrow floats multiply in f32 then cast (free: kernel is mem-bound)."""
    if jnp.issubdtype(x.dtype, jnp.floating) and jnp.dtype(x.dtype).itemsize < 4:
        return (x.astype(jnp.float32) * jnp.float32(-coeff)).astype(x.dtype)
    return x * jnp.asarray(-coeff, x.dtype)


# ----------------------------- kernel ----------------------------------------

def _grl_bwd_kernel(g_ref, o_ref, *, coeff):
    # One VALU multiply (plus casts for narrow floats) per vreg: pure HBM stream.
    o_ref[...] = _neg_scale(g_ref[...], coeff)


# ----------------------------- wrapper ----------------------------------------

def _grl_backward(g, coeff, *, min_pallas_bytes=_SMALL_BYPASS_BYTES):
    """Compute -coeff * g with a tiled, lane-dense Pallas streaming kernel."""
    coeff = float(coeff)
    n = g.size
    itemsize = jnp.dtype(g.dtype).itemsize

    # Small-tensor bypass: the custom-call launch cost dominates, let XLA fuse.
    if n == 0 or n * itemsize < min_pallas_bytes:
        return _neg_scale(g, coeff)

    sub = _sublane_multiple(g.dtype)

    # ---- lane-dense 2-D view (metadata-only reshape when 128 | n) -----------
    divisors = [c for c in _LANE_CANDIDATES if n % c == 0]
    cols = next((c for c in divisors if n // c >= sub),
                divisors[-1] if divisors else None)

    if cols is None:
        # Element count not a multiple of 128 lanes: pad the flat view up to a
        # multiple of the lane width and reuse the tiled path (tiny pad, but it
        # does cost one extra HBM copy of the array).
        # TODO(synk): masked-tail variant (pltpu.store with lane mask) to avoid
        # the pad copy on this rare path.
        cols = _PAD_COLS
        n_pad = pl.cdiv(n, cols) * cols
        flat = jnp.pad(g.reshape(-1), (0, n_pad - n))
    else:
        n_pad = n
        flat = g.reshape(-1)

    rows = n_pad // cols
    g2d = flat.reshape(rows, cols)

    # ---- block sizing: as large as VMEM comfortably allows -------------------
    vmem_cap = _vmem_capacity_bytes()
    # in + out, each double-buffered => ~4x block bytes of VMEM. Keep that at
    # <= vmem_cap/4: 8 MiB blocks on v5e/v6e (128 MiB), 4 MiB on v7x (64 MiB).
    target_block_bytes = max(256 << 10, min(8 << 20, vmem_cap // 16))

    tile_rows = min(rows, max(sub, target_block_bytes // (cols * itemsize)))
    # Keep >= 4 grid blocks when there is enough work: DMA pipelining overlap
    # and >= 2 blocks per TensorCore on v7x megacore.
    if rows >= 4 * sub:
        tile_rows = min(tile_rows, pl.cdiv(rows, 4))
    if tile_rows < rows:
        # Non-full blocks must keep the sublane dim a multiple of the packed tile.
        tile_rows = max(sub, (tile_rows // sub) * sub)

    num_blocks = pl.cdiv(rows, tile_rows)
    if num_blocks > 1 and num_blocks % 2 == 1:
        # Megacore balance (v7x): prefer an even block count so both TCs get the
        # same number of blocks (heuristic; keep original split if it can't).
        cand = max(sub, pl.cdiv(pl.cdiv(rows, num_blocks + 1), sub) * sub)
        if pl.cdiv(rows, cand) % 2 == 0:
            tile_rows = cand
            num_blocks = pl.cdiv(rows, cand)

    block_bytes = tile_rows * cols * itemsize
    # Explicit scoped-VMEM limit so large blocks compile on every generation
    # (v5e default scoped limit is only 16 MiB).
    vmem_limit = int(min(vmem_cap, max(32 << 20, 6 * block_bytes)))

    kernel = functools.partial(_grl_bwd_kernel, coeff=coeff)
    out2d = pl.pallas_call(
        kernel,
        out_shape=jax.ShapeDtypeStruct((rows, cols), g.dtype),
        grid_spec=pltpu.PrefetchScalarGridSpec(
            num_scalar_prefetch=0,
            grid=(num_blocks,),
            in_specs=[pl.BlockSpec((tile_rows, cols), lambda i: (i, 0))],
            out_specs=pl.BlockSpec((tile_rows, cols), lambda i: (i, 0)),
        ),
        compiler_params=pltpu.CompilerParams(
            dimension_semantics=("parallel",),
            vmem_limit_bytes=vmem_limit,
        ),
        cost_estimate=pl.CostEstimate(
            flops=rows * cols,
            transcendentals=0,
            bytes_accessed=2 * rows * cols * itemsize,
        ),
        input_output_aliases={0: 0},
    )(g2d)

    out_flat = out2d.reshape(-1)
    if n_pad != n:
        out_flat = out_flat[:n]
    return out_flat.reshape(g.shape)


# ----------------------------- custom VJP -------------------------------------

@functools.partial(jax.custom_vjp, nondiff_argnums=(1,))
def gradient_reverse_layer(x, coeff=1.0):
    """GRL forward: identity (`input * 1.0` in PyTorch) — no kernel needed."""
    return x


def _grl_fwd_rule(x, coeff):
    return x, None


def _grl_bwd_rule(coeff, _res, g):
    return (_grl_backward(g, coeff),)


gradient_reverse_layer.defvjp(_grl_fwd_rule, _grl_bwd_rule)


# ----------------------------- main -------------------------------------------

if __name__ == "__main__":
    key = jax.random.PRNGKey(0)
    # NCHW input consistent with typical conv-feature use of GRL.
    x = jax.random.normal(key, (2, 4, 16, 16), dtype=jnp.float32)
    coeff = 0.5

    # Forward: identity, zero-cost (no kernel launch, no HBM traffic).
    y = jax.block_until_ready(gradient_reverse_layer(x, coeff))
    assert y.shape == x.shape and y.dtype == x.dtype
    assert jnp.array_equal(y, x), "forward must be identity"

    # Backward via jax.grad: d/dx sum(GRL(x)) == -coeff everywhere.
    # (Tiny tensor -> hits the fused-XLA bypass; semantics identical.)
    grad = jax.grad(lambda a: jnp.sum(gradient_reverse_layer(a, coeff)))(x)
    grad = jax.block_until_ready(grad)
    assert jnp.allclose(grad, -coeff * jnp.ones_like(x)), "backward must be -coeff * g"

    # Exercise the Pallas streaming kernel directly (force past the bypass).
    g = jax.random.normal(jax.random.PRNGKey(1), x.shape, dtype=jnp.float32)
    gi = jax.block_until_ready(_grl_backward(g, coeff, min_pallas_bytes=0))
    assert jnp.allclose(gi, -coeff * g, rtol=1e-6, atol=1e-6)

    # bf16 gradients: dtype-aware sublane rounding + f32-math multiply.
    gb = jax.random.normal(jax.random.PRNGKey(2), (16, 256), dtype=jnp.bfloat16)
    gib = jax.block_until_ready(_grl_backward(gb, coeff, min_pallas_bytes=0))
    assert jnp.allclose(gib.astype(jnp.float32), -coeff * gb.astype(jnp.float32),
                        rtol=1e-2, atol=1e-2)

    # Ragged size (not a multiple of 128 lanes) -> padded fallback path.
    gr = jax.random.normal(jax.random.PRNGKey(3), (3, 5, 7), dtype=jnp.float32)
    gir = jax.block_until_ready(_grl_backward(gr, coeff, min_pallas_bytes=0))
    assert jnp.allclose(gir, -coeff * gr, rtol=1e-6, atol=1e-6)

    print("KERNEL_OK")
</pallas_src>

<mosaic_0001>
module attributes {stable_mosaic.version = 11 : i64} {
  func.func @_grl_bwd_kernel(%arg0: i32, %arg1: memref<8x256xf32, #tpu.memory_space<vmem>>, %arg2: memref<8x256xf32, #tpu.memory_space<vmem>>) attributes {dimension_semantics = [#tpu.dimension_semantics<parallel>], iteration_bounds = array<i64: 1>, scalar_prefetch = 0 : i64, scratch_operands = 0 : i64, tpu.core_type = #tpu.core_type<tc>, window_params = [{transform_indices = @transform_0, window_bounds = array<i64: 8, 256>}, {transform_indices = @transform_1, window_bounds = array<i64: 8, 256>}]} {
    %c0 = arith.constant 0 : index
    %c0_0 = arith.constant 0 : index
    %0 = vector.load %arg1[%c0, %c0_0] : memref<8x256xf32, #tpu.memory_space<vmem>>, vector<8x256xf32>
    %cst = arith.constant -5.000000e-01 : f32
    %1 = vector.broadcast %cst : f32 to vector<8x256xf32>
    %2 = arith.mulf %0, %1 : vector<8x256xf32>
    %c0_1 = arith.constant 0 : index
    %c0_2 = arith.constant 0 : index
    %3 = vector.load %arg2[%c0_1, %c0_2] : memref<8x256xf32, #tpu.memory_space<vmem>>, vector<8x256xf32>
    tpu.vector_store %arg2[%c0_1, %c0_2], %2 {strides = array<i32>} : memref<8x256xf32, #tpu.memory_space<vmem>>, vector<8x256xf32>,
    return
  }
  func.func @transform_0(%arg0: i32) -> (i32, i32) {
    %c0_i32 = arith.constant 0 : i32
    %c0_i32_0 = arith.constant 0 : i32
    return %arg0, %c0_i32 : i32, i32
  }
  func.func @transform_1(%arg0: i32) -> (i32, i32) {
    %c0_i32 = arith.constant 0 : i32
    %c0_i32_0 = arith.constant 0 : i32
    return %arg0, %c0_i32 : i32, i32
  }
}

</mosaic_0001>

<bundles_post_ra>
// kernel: tpu_custom_call.1
= control target key start
LH: loop header
LB: loop body
LE: loop exit
PB: predicated region body
PF: predicated region fallthrough
CT: control target
= control target key end

     0   :  { %6 = vsyncpa [#allocation3], 0  ;;  %s106_s0 = inlined_call_operand.hbm [shape: f32[8,256], index: 0, kind: input, shape index: {}, may-alias: {0,1}]   ;;  %s107_s1 = inlined_call_operand.hbm [shape: f32[8,256], index: 1, kind: output, shape index: {}, may-alias: {0,1}]  }
   0x1   :  { %7 = vsyncpa [#allocation4], 0  ;;  %s88_s6 = smov [#allocation2]  }
   0x2   :  { %s14_s7 = sshll.u32 %s88_s6, 4  ;;  %s15_s7 = int_to_ptr.vmem [resolvable:$true] %s14_s7 }
   0x3   :  { %s52_s8 = scalar_lea.vmem %s15_s7, 256  ;;  %p57_p1 = scmp.lt.s32.totalorder %s15_s7, %s15_s7 }
   0x4   :  { %p53_p0 = scmp.ne.s32.totalorder %s15_s7, %s52_s8  ;;  %p58_p2 = scmp.lt.s32.totalorder %s52_s8, %s52_s8 }
   0x6   :  { %p59_p3 = por %p58_p2, %p57_p1 }
   0x8   :  { %p60_p4 = pnand %p59_p3, %p53_p0 }
   0xa   :  { %63 = shalt.err (!%p60_p4)
}
   0xb   :  { %17 = dma.hbm_to_vmem [thread:$0]  %s106_s0, 256, %s15_s7, [#allocation3]  }
   0xc   :  { %84 = dma.done.wait [#allocation3], 256  }
   0xd   :  { %85 = vsyncadd [#allocation3], 4294967040  ;;  %s89_s11 = smov [#allocation5]   ;;  %v21_v0 = vld [vmem:[#allocation2] sm:$0xff]  ;;  %v22_v1 = vld [vmem:[#allocation2 + $0x8] sm:$0xff] }
   0xe   :  { %s33_s12 = sshll.u32 %s89_s11, 4  ;;  %v23_v2 = vmul.f32 -0.5, %v21_v0  ;;  %v24_v3 = vmul.f32 -0.5, %v22_v1  ;;  %s34_s12 = int_to_ptr.vmem [resolvable:$true] %s33_s12 }
   0xf   :  { %s64_s13 = scalar_lea.vmem %s34_s12, 256  ;;  %p69_p6 = scmp.lt.s32.totalorder %s34_s12, %s34_s12 }
  0x10   :  { %25 = vst [vmem:[#allocation5] sm:$0xff] %v23_v2  ;;  %26 = vst [vmem:[#allocation5 + $0x8] sm:$0xff] %v24_v3  ;;  %p65_p5 = scmp.ne.s32.totalorder %s34_s12, %s64_s13  ;;  %p70_p7 = scmp.lt.s32.totalorder %s64_s13, %s64_s13 }
  0x12   :  { %p71_p8 = por %p70_p7, %p69_p6 }
  0x14   :  { %p72_p9 = pnand %p71_p8, %p65_p5 }
  0x16   :  { %75 = shalt.err (!%p72_p9)
}
  0x17   :  { %36 = dma.vmem_to_hbm [thread:$0]  %s34_s12, 256, %s107_s1, [#allocation4]  }
  0x18   :  { %86 = dma.done.wait [#allocation4], 256  }
  0x19   :  { %87 = vsyncadd [#allocation4], 4294967040 }
  0x1a   :  { %40 = vsyncpa [#allocation3], 1 }
  0x1b   :  { %41 = vsyncpa [#allocation4], 1 }

</bundles_post_ra>
